<compile_context>
chip_gen: v7x
topology: tpu7x:2x2x1
jax: 0.10.0
libtpu: 0.0.40
codegen_flags: <defaults>
</compile_context>

<pallas_src>
import functools

import jax
import jax.numpy as jnp
from jax import lax
from jax.experimental import pallas as pl
from jax.experimental.pallas import tpu as pltpu


def _cross_attn_kernel(x_ref, kt_ref, vt_ref, wq_ref, wo_ref, bo_ref, o_ref, *,
                       heads, dim_head, compute_dtype):
    # x_ref : (C, St)        lane-dense query hidden-state tile (St on the lane axis)
    # kt_ref: (inner, Skv)   pre-projected keys, attention scale already folded in
    # vt_ref: (inner, Skv)   pre-projected values
    # wq_ref: (inner, C)     wo_ref: (C, inner)   (compute dtype, nn.Linear layout)
    # bo_ref: (C, 1) f32     o_ref : (C, St)
    xb = x_ref[...].astype(compute_dtype)                               # (C, St)
    St = xb.shape[-1]
    kt = kt_ref[...]                                                    # (inner, Skv)
    vt = vt_ref[...]
    Skv = kt.shape[-1]
    inner = heads * dim_head

    # Q projection: NN dot, no operand transpose, bf16 -> f32 accumulation.
    qt = lax.dot_general(wq_ref[...], xb, (((1,), (0,)), ((), ())),
                         preferred_element_type=jnp.float32)            # (inner, St)

    # Head split = leading-dim reshape only (dim_head multiple of 8 -> no relayout).
    qh = qt.astype(compute_dtype).reshape(heads, dim_head, St)          # (h, dh, St)
    kh = kt.reshape(heads, dim_head, Skv)                               # (h, dh, Skv)
    vh = vt.reshape(heads, dim_head, Skv)                               # (h, dh, Skv)

    # Scores for all heads in one batched MXU contraction over dh (no K transpose):
    # scores[h, kv, s] = sum_d k[h, d, kv] * q[h, d, s].
    scores = lax.dot_general(kh, qh, (((1,), (1,)), ((0,), (0,))),
                             preferred_element_type=jnp.float32)        # (h, Skv, St)

    # Numerically-stable softmax over the key (sublane) axis, f32 throughout;
    # normalization is deferred past the PV matmul.
    m = jnp.max(scores, axis=1, keepdims=True)                          # (h, 1, St)
    e = jnp.exp(scores - m)                                             # f32
    denom = jnp.sum(e, axis=1, keepdims=True)                           # (h, 1, St)

    # PV with unnormalized probabilities (bf16 into the MXU), then normalize the
    # smaller (h, dh, St) result with an EUP approximate reciprocal.
    ot = lax.dot_general(vh, e.astype(compute_dtype), (((2,), (1,)), ((0,), (0,))),
                         preferred_element_type=jnp.float32)            # (h, dh, St)
    ot = ot * pl.reciprocal(denom, approx=True)

    # Fold heads back to inner (pure reshape; inner index = h*dh + d, matching
    # batch_to_head_dim ordering), output projection + bias (to_out[0]); to_out[1]
    # is Dropout(p=0) == identity.
    attn = ot.astype(compute_dtype).reshape(inner, St)                  # (inner, St)
    out = lax.dot_general(wo_ref[...], attn, (((1,), (0,)), ((), ())),
                          preferred_element_type=jnp.float32)           # (C, St)
    o_ref[...] = (out + bo_ref[...]).astype(o_ref.dtype)


def _tpu_vmem_capacity_bytes():
    """Physical VMEM per core; conservative (v7x, 64 MiB) fallback if query fails."""
    try:
        return int(pltpu.get_tpu_info().vmem_capacity_bytes)
    except Exception:
        return 64 << 20


def attention_forward(x_nchw, encoder_hidden_states, params, *, heads, dim_head,
                      s_tile=None, vmem_limit_bytes=None,
                      compute_dtype=jnp.bfloat16):
    """Cross attention on NCHW spatial input, mirroring Attention.forward."""
    B, C, H, W = x_nchw.shape
    S = H * W
    Skv = encoder_hidden_states.shape[1]
    inner = heads * dim_head
    scale = float(dim_head) ** -0.5

    vmem = _tpu_vmem_capacity_bytes()
    if s_tile is None:
        # Bigger lane-dense tiles where VMEM allows (v5e/v6e 128 MiB), smaller on v7x.
        s_tile = 1024 if vmem >= (96 << 20) else 256
    if vmem_limit_bytes is None:
        vmem_limit_bytes = min(vmem * 3 // 4, 100 << 20)

    # Lane-dense I/O: NCHW -> (B, C, S) is a pure reshape (no HBM transpose).
    x = x_nchw.reshape(B, C, S)

    # S tiling: a partial block's lane dim must be a multiple of 128 (or the full
    # extent). Query columns are independent, so zero-padding S is exact.
    if s_tile >= S:
        s_tile = S
        s_pad = S
    else:
        s_tile = max(128, (s_tile // 128) * 128)
        s_pad = -(-S // s_tile) * s_tile
        if s_pad != S:
            x = jnp.pad(x, ((0, 0), (0, 0), (0, s_pad - S)))
    num_s_tiles = s_pad // s_tile

    # Hoisted out of the tile loop (one tiny XLA GEMM per call, not per S tile):
    # K/V projections in (inner, Skv) layout with the attention scale folded into K,
    # plus one-time bf16 casts of all MXU-resident operands (f32 accumulation and
    # the f32 bias add stay inside the kernel).
    wq = params["wq"].astype(compute_dtype)                                # (inner, C)
    wo = params["wo"].astype(compute_dtype)                                # (C, inner)
    bo = params["bo"].reshape(C, 1).astype(jnp.float32)                    # (C, 1)
    kt = (scale * jnp.einsum("od,bsd->bos", params["wk"],
                             encoder_hidden_states)).astype(compute_dtype)  # (B, inner, Skv)
    vt = jnp.einsum("od,bsd->bos", params["wv"],
                    encoder_hidden_states).astype(compute_dtype)             # (B, inner, Skv)

    kernel = functools.partial(_cross_attn_kernel, heads=heads, dim_head=dim_head,
                               compute_dtype=compute_dtype)

    out = pl.pallas_call(
        kernel,
        out_shape=jax.ShapeDtypeStruct((B, C, s_pad), x_nchw.dtype),
        grid=(B, num_s_tiles),
        in_specs=[
            pl.BlockSpec((None, C, s_tile), lambda b, s: (b, 0, s)),       # x tile
            # Constant index_maps over the S-tile axis -> fetched once, not per tile.
            # TODO(synk): on v7x, pipeline_mode=pl.Buffered(1) on these constant
            # blocks would reclaim the second pipeline buffer under 64 MiB VMEM.
            pl.BlockSpec((None, inner, Skv), lambda b, s: (b, 0, 0)),      # K^T (scaled)
            pl.BlockSpec((None, inner, Skv), lambda b, s: (b, 0, 0)),      # V^T
            pl.BlockSpec((inner, C), lambda b, s: (0, 0)),                 # wq
            pl.BlockSpec((C, inner), lambda b, s: (0, 0)),                 # wo
            pl.BlockSpec((C, 1), lambda b, s: (0, 0)),                     # bo
        ],
        out_specs=pl.BlockSpec((None, C, s_tile), lambda b, s: (b, 0, s)),
        compiler_params=pltpu.CompilerParams(
            dimension_semantics=("parallel", "parallel"),
            vmem_limit_bytes=int(vmem_limit_bytes)),
    )(x, kt, vt, wq, wo, bo)

    if s_pad != S:
        out = out[:, :, :S]
    # (B, C, S) -> NCHW is a pure reshape; residual_connection=False and
    # rescale_output_factor=1.0 -> nothing else to do.
    return out.reshape(B, C, H, W)


def reference_forward(x_nchw, ehs, params, *, heads, dim_head):
    """Pure-JAX f32 reference (mirrors AttnProcessor2_0) for correctness check."""
    B, C, H, W = x_nchw.shape
    S = H * W
    scale = float(dim_head) ** -0.5
    x = jnp.transpose(x_nchw.reshape(B, C, S), (0, 2, 1))               # (B, S, C)
    q = x @ params["wq"].T                                              # (B, S, inner)
    k = ehs @ params["wk"].T
    v = ehs @ params["wv"].T

    def split(t):
        Bt, St, _ = t.shape
        return jnp.transpose(t.reshape(Bt, St, heads, dim_head), (0, 2, 1, 3))

    qh, kh, vh = split(q), split(k), split(v)                           # (B, h, S, dh)
    scores = jnp.einsum("bhqd,bhkd->bhqk", qh, kh) * scale
    probs = jax.nn.softmax(scores, axis=-1)
    o = jnp.einsum("bhqk,bhkd->bhqd", probs, vh)
    o = jnp.transpose(o, (0, 2, 1, 3)).reshape(B, S, heads * dim_head)
    o = o @ params["wo"].T + params["bo"]
    return jnp.transpose(o, (0, 2, 1)).reshape(B, C, H, W)


if __name__ == "__main__":
    # Module-consistent small config: query_dim = channels = 4 (NCHW input),
    # cross_attention_dim = 32, heads = 2, dim_head = 8 -> inner_dim = 16.
    B, C, H, W = 2, 4, 16, 16
    Skv, Dc = 8, 32
    heads, dim_head = 2, 8
    inner = heads * dim_head

    key = jax.random.PRNGKey(0)
    kx, ke, k1, k2, k3, k4, k5 = jax.random.split(key, 7)

    x = jax.random.normal(kx, (B, C, H, W), dtype=jnp.float32)
    ehs = jax.random.normal(ke, (B, Skv, Dc), dtype=jnp.float32)

    # Deterministic synthetic weights in PyTorch nn.Linear (out, in) layout.
    params = {
        "wq": 0.1 * jax.random.normal(k1, (inner, C), dtype=jnp.float32),
        "wk": 0.1 * jax.random.normal(k2, (inner, Dc), dtype=jnp.float32),
        "wv": 0.1 * jax.random.normal(k3, (inner, Dc), dtype=jnp.float32),
        "wo": 0.1 * jax.random.normal(k4, (C, inner), dtype=jnp.float32),
        "bo": 0.1 * jax.random.normal(k5, (C,), dtype=jnp.float32),
    }

    # Force S_TILE=128 so S=256 exercises the multi-tile grid (2 S tiles per batch).
    out = attention_forward(x, ehs, params, heads=heads, dim_head=dim_head, s_tile=128)
    out = jax.block_until_ready(out)
    ref = reference_forward(x, ehs, params, heads=heads, dim_head=dim_head)
    assert out.shape == (B, C, H, W)
    # Tolerance covers bf16 MXU operands (f32 accumulation) + the EUP approximate
    # reciprocal in the softmax normalization.
    assert jnp.allclose(out, ref, atol=2e-2, rtol=2e-2), "mismatch vs JAX reference"

    # Exercise the S-padding path (S = 15*15 = 225 -> padded to 256, 2 tiles).
    x2 = jax.random.normal(kx, (B, C, 15, 15), dtype=jnp.float32)
    out2 = attention_forward(x2, ehs, params, heads=heads, dim_head=dim_head, s_tile=128)
    out2 = jax.block_until_ready(out2)
    ref2 = reference_forward(x2, ehs, params, heads=heads, dim_head=dim_head)
    assert out2.shape == (B, C, 15, 15)
    assert jnp.allclose(out2, ref2, atol=2e-2, rtol=2e-2), "mismatch (padded S) vs reference"

    print("KERNEL_OK")
</pallas_src>

<mosaic_0001>
module attributes {stable_mosaic.version = 11 : i64} {
  func.func @_cross_attn_kernel(%arg0: i32, %arg1: i32, %arg2: memref<1x4x128xf32, #tpu.memory_space<vmem>>, %arg3: memref<1x16x8xbf16, #tpu.memory_space<vmem>>, %arg4: memref<1x16x8xbf16, #tpu.memory_space<vmem>>, %arg5: memref<16x4xbf16, #tpu.memory_space<vmem>>, %arg6: memref<4x16xbf16, #tpu.memory_space<vmem>>, %arg7: memref<4x1xf32, #tpu.memory_space<vmem>>, %arg8: memref<1x4x128xf32, #tpu.memory_space<vmem>>) attributes {dimension_semantics = [#tpu.dimension_semantics<parallel>, #tpu.dimension_semantics<parallel>], iteration_bounds = array<i64: 2, 2>, scalar_prefetch = 0 : i64, scratch_operands = 0 : i64, tpu.core_type = #tpu.core_type<tc>, window_params = [{transform_indices = @transform_0, window_bounds = array<i64: 1, 4, 128>}, {transform_indices = @transform_1, window_bounds = array<i64: 1, 16, 8>}, {transform_indices = @transform_2, window_bounds = array<i64: 1, 16, 8>}, {pipeline_mode = #tpu.pipeline_mode<synchronous>, transform_indices = @transform_3, window_bounds = array<i64: 16, 4>}, {pipeline_mode = #tpu.pipeline_mode<synchronous>, transform_indices = @transform_4, window_bounds = array<i64: 4, 16>}, {pipeline_mode = #tpu.pipeline_mode<synchronous>, transform_indices = @transform_5, window_bounds = array<i64: 4, 1>}, {transform_indices = @transform_6, window_bounds = array<i64: 1, 4, 128>}]} {
    %c0 = arith.constant 0 : index
    %c0_0 = arith.constant 0 : index
    %c0_1 = arith.constant 0 : index
    %0 = vector.load %arg2[%c0, %c0_0, %c0_1] : memref<1x4x128xf32, #tpu.memory_space<vmem>>, vector<1x4x128xf32>
    %1 = vector.shape_cast %0 : vector<1x4x128xf32> to vector<4x128xf32>
    %2 = arith.truncf %1 : vector<4x128xf32> to vector<4x128xbf16>
    %c0_2 = arith.constant 0 : index
    %c0_3 = arith.constant 0 : index
    %c0_4 = arith.constant 0 : index
    %3 = vector.load %arg3[%c0_2, %c0_3, %c0_4] : memref<1x16x8xbf16, #tpu.memory_space<vmem>>, vector<1x16x8xbf16>
    %4 = vector.shape_cast %3 : vector<1x16x8xbf16> to vector<16x8xbf16>
    %c0_5 = arith.constant 0 : index
    %c0_6 = arith.constant 0 : index
    %c0_7 = arith.constant 0 : index
    %5 = vector.load %arg4[%c0_5, %c0_6, %c0_7] : memref<1x16x8xbf16, #tpu.memory_space<vmem>>, vector<1x16x8xbf16>
    %6 = vector.shape_cast %5 : vector<1x16x8xbf16> to vector<16x8xbf16>
    %c0_8 = arith.constant 0 : index
    %c0_9 = arith.constant 0 : index
    %7 = vector.load %arg5[%c0_8, %c0_9] : memref<16x4xbf16, #tpu.memory_space<vmem>>, vector<16x4xbf16>
    %cst = arith.constant dense<0.000000e+00> : vector<16x128xf32>
    %8 = tpu.matmul %7, %2, %cst {dimension_numbers = #tpu.dot_dimension_numbers<[1], [0], [0], [1], [0, 0, 1, 1], [], []>} : vector<16x4xbf16>, vector<4x128xbf16>, vector<16x128xf32> -> vector<16x128xf32>
    %9 = arith.truncf %8 : vector<16x128xf32> to vector<16x128xbf16>
    %10 = vector.shape_cast %9 : vector<16x128xbf16> to vector<2x8x128xbf16>
    %11 = vector.shape_cast %4 : vector<16x8xbf16> to vector<2x8x8xbf16>
    %12 = vector.shape_cast %6 : vector<16x8xbf16> to vector<2x8x8xbf16>
    %cst_10 = arith.constant dense<0.000000e+00> : vector<2x8x128xf32>
    %13 = tpu.matmul %11, %10, %cst_10 {dimension_numbers = #tpu.dot_dimension_numbers<[1], [1], [2], [2], [0, 0, 0, 2, 1, 2], [0], [0]>} : vector<2x8x8xbf16>, vector<2x8x128xbf16>, vector<2x8x128xf32> -> vector<2x8x128xf32>
    %cst_11 = arith.constant dense<0xFF800000> : vector<2x128xf32>
    %14 = vector.multi_reduction <maximumf>, %13, %cst_11 [1] : vector<2x8x128xf32> to vector<2x128xf32>
    %15 = vector.shape_cast %14 : vector<2x128xf32> to vector<2x1x128xf32>
    %16 = vector.broadcast %15 : vector<2x1x128xf32> to vector<2x8x128xf32>
    %17 = arith.subf %13, %16 : vector<2x8x128xf32>
    %18 = math.exp %17 : vector<2x8x128xf32>
    %cst_12 = arith.constant dense<0.000000e+00> : vector<2x128xf32>
    %19 = vector.multi_reduction <add>, %18, %cst_12 [1] : vector<2x8x128xf32> to vector<2x128xf32>
    %20 = vector.shape_cast %19 : vector<2x128xf32> to vector<2x1x128xf32>
    %21 = arith.truncf %18 : vector<2x8x128xf32> to vector<2x8x128xbf16>
    %cst_13 = arith.constant dense<0.000000e+00> : vector<2x8x128xf32>
    %22 = tpu.matmul %12, %21, %cst_13 {dimension_numbers = #tpu.dot_dimension_numbers<[2], [1], [1], [2], [0, 0, 0, 1, 1, 2], [0], [0]>} : vector<2x8x8xbf16>, vector<2x8x128xbf16>, vector<2x8x128xf32> -> vector<2x8x128xf32>
    %23 = tpu.reciprocal %20 {approx = true} : vector<2x1x128xf32> -> vector<2x1x128xf32>
    %24 = vector.broadcast %23 : vector<2x1x128xf32> to vector<2x8x128xf32>
    %25 = arith.mulf %22, %24 : vector<2x8x128xf32>
    %26 = arith.truncf %25 : vector<2x8x128xf32> to vector<2x8x128xbf16>
    %27 = vector.shape_cast %26 : vector<2x8x128xbf16> to vector<16x128xbf16>
    %c0_14 = arith.constant 0 : index
    %c0_15 = arith.constant 0 : index
    %28 = vector.load %arg6[%c0_14, %c0_15] : memref<4x16xbf16, #tpu.memory_space<vmem>>, vector<4x16xbf16>
    %cst_16 = arith.constant dense<0.000000e+00> : vector<4x128xf32>
    %29 = tpu.matmul %28, %27, %cst_16 {dimension_numbers = #tpu.dot_dimension_numbers<[1], [0], [0], [1], [0, 0, 1, 1], [], []>} : vector<4x16xbf16>, vector<16x128xbf16>, vector<4x128xf32> -> vector<4x128xf32>
    %c0_17 = arith.constant 0 : index
    %c0_18 = arith.constant 0 : index
    %30 = vector.load %arg7[%c0_17, %c0_18] : memref<4x1xf32, #tpu.memory_space<vmem>>, vector<4x1xf32>
    %31 = vector.broadcast %30 : vector<4x1xf32> to vector<4x128xf32>
    %32 = arith.addf %29, %31 : vector<4x128xf32>
    %c0_19 = arith.constant 0 : index
    %c0_20 = arith.constant 0 : index
    %c0_21 = arith.constant 0 : index
    %33 = vector.load %arg8[%c0_19, %c0_20, %c0_21] : memref<1x4x128xf32, #tpu.memory_space<vmem>>, vector<1x4x128xf32>
    %34 = vector.shape_cast %33 : vector<1x4x128xf32> to vector<4x128xf32>
    %35 = vector.shape_cast %32 : vector<4x128xf32> to vector<1x4x128xf32>
    tpu.vector_store %arg8[%c0_19, %c0_20, %c0_21], %35 {strides = array<i32>} : memref<1x4x128xf32, #tpu.memory_space<vmem>>, vector<1x4x128xf32>,
    return
  }
  func.func @transform_0(%arg0: i32, %arg1: i32) -> (i32, i32, i32) {
    %c0_i32 = arith.constant 0 : i32
    %c0_i32_0 = arith.constant 0 : i32
    return %arg0, %c0_i32, %arg1 : i32, i32, i32
  }
  func.func @transform_1(%arg0: i32, %arg1: i32) -> (i32, i32, i32) {
    %c0_i32 = arith.constant 0 : i32
    %c0_i32_0 = arith.constant 0 : i32
    %c0_i32_1 = arith.constant 0 : i32
    return %arg0, %c0_i32, %c0_i32_0 : i32, i32, i32
  }
  func.func @transform_2(%arg0: i32, %arg1: i32) -> (i32, i32, i32) {
    %c0_i32 = arith.constant 0 : i32
    %c0_i32_0 = arith.constant 0 : i32
    %c0_i32_1 = arith.constant 0 : i32
    return %arg0, %c0_i32, %c0_i32_0 : i32, i32, i32
  }
  func.func @transform_3(%arg0: i32, %arg1: i32) -> (i32, i32) {
    %c0_i32 = arith.constant 0 : i32
    %c0_i32_0 = arith.constant 0 : i32
    %c0_i32_1 = arith.constant 0 : i32
    return %c0_i32, %c0_i32_0 : i32, i32
  }
  func.func @transform_4(%arg0: i32, %arg1: i32) -> (i32, i32) {
    %c0_i32 = arith.constant 0 : i32
    %c0_i32_0 = arith.constant 0 : i32
    %c0_i32_1 = arith.constant 0 : i32
    return %c0_i32, %c0_i32_0 : i32, i32
  }
  func.func @transform_5(%arg0: i32, %arg1: i32) -> (i32, i32) {
    %c0_i32 = arith.constant 0 : i32
    %c0_i32_0 = arith.constant 0 : i32
    %c0_i32_1 = arith.constant 0 : i32
    return %c0_i32, %c0_i32_0 : i32, i32
  }
  func.func @transform_6(%arg0: i32, %arg1: i32) -> (i32, i32, i32) {
    %c0_i32 = arith.constant 0 : i32
    %c0_i32_0 = arith.constant 0 : i32
    return %arg0, %c0_i32, %arg1 : i32, i32, i32
  }
}

</mosaic_0001>

<bundles_post_ra>
// kernel: tpu_custom_call.1
= control target key start
LH: loop header
LB: loop body
LE: loop exit
PB: predicated region body
PF: predicated region fallthrough
CT: control target
= control target key end

     0   :  { %11 = vsyncpa [#allocation3], 0  ;;  %s1302_s0 = inlined_call_operand.vmem [shape: f32[2,4,256], index: 0, kind: input, shape index: {}]   ;;  %s1303_s1 = inlined_call_operand.vmem [shape: bf16[2,16,8], index: 1, kind: input, shape index: {}]   ;;  %s1304_s2 = inlined_call_operand.vmem [shape: bf16[2,16,8], index: 2, kind: input, shape index: {}]   ;;  %s1305_s3 = inlined_call_operand.vmem [shape: bf16[16,4], index: 3, kind: input, shape index: {}]   ;;  %s1306_s4 = inlined_call_operand.vmem [shape: bf16[4,16], index: 4, kind: input, shape index: {}]   ;;  %s1307_s5 = inlined_call_operand.vmem [shape: f32[4,1], index: 5, kind: input, shape index: {}]   ;;  %s1308_s6 = inlined_call_operand.hbm [shape: f32[2,4,256], index: 6, kind: output, shape index: {}]  }
   0x1   :  { %13 = vsyncpa [#allocation3 + $0x1], 0  ;;  %s1116_s21 = smov 0   ;;  %s1118_s22 = smov 0  }
   0x2   :  { %s1120_s23 = smov 0   ;;  %s1122_s24 = smov 0  }
   0x3   :  { %s1124_s25 = smov 0   ;;  %s1126_s26 = smov 0  }
   0x4   :  { %s1128_s27 = smov 0   ;;  %s1130_s28 = smov 0  }
   0x5 LB: > { %1312 = sst [smem:[#allocation5_spill]] %s1071_s27  ;;  %s816_s29 = sadd.s32 4294967295, %s1075_s28   ;;  %s1075_s28 = sphi %s1130_s28, %s19_s28   ;;  %s1071_s27 = sphi %s1128_s27, %s1319_s27   ;;  %s1067_s26 = sphi %s1126_s26, %s1324_s26   ;;  %s1063_s25 = sphi %s1124_s25, %s1317_s25   ;;  %s1059_s24 = sphi %s1122_s24, %s1323_s24   ;;  %s1055_s23 = sphi %s1120_s23, %s1322_s23   ;;  %s1051_s22 = sphi %s1118_s22, %s1321_s22   ;;  %s1047_s21 = sphi %s1116_s21, %s1320_s21  }
   0x6   : > { %s817_s30 = sadd.s32 4294967294, %s1075_s28   ;;  %s28_s7 = sadd.s32 1, %s1067_s26 }
   0x7   : > { %p29_p0 = scmp.ge.s32.totalorder %s28_s7, 2  ;;  %s31_s8 = sadd.s32 1, %s1071_s27 }
   0x8   : > { %p193_p1 = scmp.ne.s32.totalorder %s1055_s23, %s1051_s22  ;;  %p194_p2 = scmp.eq.s32.totalorder %s816_s29, 3 }
   0x9   : > { %s1326_s7 = smov (%p29_p0, %s28_s7), 0  ;;  %s1328_s8 = smov (!%p29_p0, %s31_s8), %s1071_s27 }
   0xa   : > { %1313 = sst [smem:[#allocation6_spill]] %s1326_s7  ;;  %s179_s9 = ssub.s32 %s1067_s26, %s1326_s7 }
   0xb   : > { %p1167_p3 = por %p194_p2, %p193_p1  ;;  %p33_p4 = scmp.ge.s32.totalorder %s1328_s8, 2 }
   0xc   : > { %p199_p5 = scmp.ne.s32.totalorder %s1051_s22, %s1047_s21  ;;  %p200_p6 = scmp.eq.s32.totalorder %s817_s30, 3 }
   0xd   : > { %p820_p7 = scmp.ge.s32.totalorder %s1075_s28, 1  ;;  %s1330_s8 = smov (%p33_p4, %s1328_s8), 0 }
   0xe   : > { %1315 = sst [smem:[#allocation7_spill]] %s1330_s8  ;;  %p1176_p8 = por %p200_p6, %p199_p5 }
   0xf   : > { %p254_p9 = scmp.lt.s32.totalorder %s1075_s28, 5  ;;  %s178_s12 = ssub.s32 %s1071_s27, %s1330_s8 }
  0x10   : > { %s183_s13 = sadd.s32 1, %s1055_s23  ;;  %s180_s14 = sor.u32 %s179_s9, %s178_s12 }
  0x11   : > { %p255_p10 = pnand %p820_p7, %p254_p9  ;;  %p181_p11 = scmp.eq.s32.totalorder %s180_s14, 0 }
  0x12   : > { %p297_p12 = scmp.lt.s32.totalorder (!%p255_p10), %s1063_s25, 1  ;;  %p299_p13 = scmp.lt.s32.totalorder (!%p255_p10), %s1059_s24, 1  ;;  %v1077_v0 = vmov (!%p255_p10), 0.0   ;;  %vm1078_vm0 = vmmov (!%p255_p10), 0   ;;  %vm333_vm1 = vcmask (!%p255_p10), 1041408   ;;  %v972_v6 = vld [vmem:[%s1305_s3] sm:$0xff] (!%p255_p10)  }
  0x13   : > { %s1185_s15 = scalar_select %p181_p11, %s1055_s23, %s183_s13  }
  0x14   : > { %258 = sbr.rel (%p255_p10) target bundleno = 952 (0x3b8), region = 44  ;;  %860 = vmatprep.subr.bf16.mxu0 (!%p255_p10), %v1077_v0  ;;  %862 = vmatprep.mubr.msk.bf16.mxu0 (!%p255_p10), %vm1078_vm0, %v1077_v0  ;;  %vm329_vm2 = vcmask (!%p255_p10), 31744   ;;  %vm404_vm3 = vcmask (!%p255_p10), 1043456   ;;  %vm400_vm4 = vcmask (!%p255_p10), 64512   ;;  %v641_v49 = vld [vmem:[%s1307_s5] sm:$0xf] (!%p255_p10) }
  0x15   : > { %866 = vmatprep.subr.bf16.mxu1 (!%p255_p10), %v1077_v0  ;;  %868 = vmatprep.mubr.msk.bf16.mxu1 (!%p255_p10), %vm1078_vm0, %v1077_v0  ;;  %v1079_v50 = vmov (!%p255_p10), 0   ;;  %vm653_vm5 = vcmask (!%p255_p10), 130048   ;;  %s839_s30 = sshll.u32 (!%p255_p10), %s1063_s25, 1 }
  0x16   : > { %970 = vset.pattern.permute.xlu1 (!%p255_p10), %v1079_v50 }
  0x17   : > { %644 = vperm.xlu1 (!%p255_p10), %970, %v641_v49  }
  0x1b   : > { %s1193_s16 = scalar_select %p297_p12, %s1063_s25, 1 }
  0x1c   : > { %s300_s17 = scalar_select %p299_p13, %s1059_s24, 1 }
  0x1d   : > { %s822_s18 = sshll.u32 %s1193_s16, 1  ;;  %s843_s19 = sshll.u32 %s1193_s16, 3 }
  0x1e   : > { %s302_s20 = sadd.s32 %s822_s18, %s300_s17  ;;  %s309_s9 = scalar_lea.vmem %s1303_s1, %s843_s19 }
  0x1f   : > { %s823_s12 = sshll.u32 %s302_s20, 2  ;;  %v318_v1 = vld [vmem:[%s309_s9] sm:$0xf]  ;;  %v319_v3 = vld [vmem:[%s309_s9 + $0x4] sm:$0xf]  ;;  %s294_s20 = sand.u32 1, %s1051_s22  }
  0x20   : > { %s304_s8 = scalar_lea.vmem %s1302_s0, %s823_s12  ;;  %384 = vxpose.xlu0.c.b16.start.end [1/1] (short) (narrow) %v318_v1, 16  ;;  %s821_s29 = sshll.u32 %s294_s20, 2 }
  0x21   : > { %v316_v2 = vld [vmem:[%s304_s8] sm:$0xf]  ;;  %s314_s8 = scalar_lea.vmem %s1304_s2, %s843_s19  ;;  %s710_s9 = sadd.s32 %s1059_s24, %s839_s30 }
  0x22   : > { %v317_v4 = vpack.c.bf16 %v316_v2, %v316_v2  ;;  %v320_v46 = vld [vmem:[%s314_s8] sm:$0xf]  ;;  %v321_v48 = vld [vmem:[%s314_s8 + $0x4] sm:$0xf]  ;;  %s840_s12 = sshll.u32 %s710_s9, 6  ;;  %s296_s13 = scalar_lea.vmem [#allocation2], %s821_s29 }
  0x23   : > { %s714_s14 = sshll.u32 %s296_s13, 4  ;;  %s1249_s8 = scalar_lea.hbm %s1308_s6, %s840_s12  ;;  %s1251_s14 = int_to_ptr.vmem [resolvable:$true] %s714_s14 }
  0x24   : > { %v335_v5 = vsel %vm333_vm1, %v317_v4, 0  ;;  %448 = vxpose.xlu0.c.b16.start.end [1/1] (short) (narrow) %v319_v3, 16  ;;  %s699_s24 = scalar_lea.sflag [#allocation3], %s294_s20  ;;  %s981_s25 = scalar_lea.vmem %s1251_s14, 64 }
  0x25   : > { %861 = vmatpush3.bf16.msra.mxu0 %v335_v5  ;;  %p982_p0 = scmp.ne.s32.totalorder %s1251_s14, %s981_s25  ;;  %s1080_s16 = smov [#allocation2]  }
  0x26   : > { %872 = vmatprep.subr.bf16.mxu0 %v1077_v0  ;;  %s985_s17 = sshll.u32 %s1080_s16, 4  ;;  %s986_s17 = int_to_ptr.vmem [resolvable:$false] %s985_s17 }
  0x27   : > { %p983_p1 = pnand %p982_p0, %p1167_p3  ;;  %s987_s18 = scalar_lea.vmem %s986_s17, 128 }
  0x28   : > { %863 = vmatmul.mubr.msk.bf16.vlgmr.msra.gmra.mrb[0].mxu0 %vm329_vm2, %v972_v6  ;;  %p988_p4 = scmp.lt.s32.totalorder %s1251_s14, %s986_s17  ;;  %p989_p5 = scmp.lt.s32.totalorder %s987_s18, %s981_s25 }
  0x29   : > { %874 = vmatprep.mubr.msk.bf16.mxu0 %vm1078_vm0, %v1077_v0  ;;  %p984_p2 = pneg %p983_p1 }
  0x2a   : > { %p990_p6 = por %p989_p5, %p988_p4 }
  0x2c   : > { %p991_p7 = pnand %p990_p6, %p984_p2 }
  0x2d   : > { %971 = vset.pattern.permute.xlu0 %v1079_v50 }
  0x86   : > { %v392_v8 = vpop.trf.xlu0 }
  0x8a   : > { %v456_v16 = vpop.trf.xlu0 }
  0xfb   : > { %v371_v7 = vpop.f32.mrb[0].mxu0 }
  0xfc   : > { %v845_v9 = vpack.c.bf16 %v371_v7, %v371_v7  ;;  %v864_v10 = vpop.f32.mrb[1].mxu0 }
  0xfd   : > { %v374_v11 = vpop.f32.mrb[2].mxu0 }
  0xfe   : > { %v846_v12 = vpack.c.bf16 %v374_v11, %v374_v11  ;;  %v865_v13 = vpop.f32.mrb[3].mxu0  ;;  %v406_v14 = vsel %vm404_vm3, %v845_v9, 0 }
  0xff   : > { %867 = vmatpush3.bf16.msra.mxu1 %v406_v14  ;;  %v645_v13 = vpop.permute.xlu1 %644 }
 0x100   : > { %v468_v15 = vsel %vm404_vm3, %v846_v12, 0  ;;  %878 = vmatprep.subr.bf16.mxu1 %v1077_v0  ;;  %v640_v12 = vld [vmem:[%s1306_s4] sm:$0x3] }
 0x101   : > { %873 = vmatpush3.bf16.msra.mxu0 %v468_v15 }
 0x102   : > { %869 = vmatmul.mubr.msk.bf16.vlgmr.msra.gmra.mrb[0].mxu1 %vm400_vm4, %v392_v8  ;;  %884 = vmatprep.subr.bf16.mxu0 %v1077_v0 }
 0x103   : > { %880 = vmatprep.mubr.msk.bf16.mxu1 %vm1078_vm0, %v1077_v0 }
 0x104   : > { %875 = vmatmul.mubr.msk.bf16.vlgmr.msra.gmra.mrb[4].mxu0 %vm400_vm4, %v456_v16 }
 0x105   : > { %886 = vmatprep.mubr.msk.bf16.mxu0 %vm1078_vm0, %v1077_v0 }
 0x1d5   : > { %v442_v17 = vpop.f32.mrb[0].mxu1 }
 0x1d6   : > { %v510_v18 = vrot.slane %v442_v17, 4  ;;  %v870_v19 = vpop.f32.mrb[1].mxu1 }
 0x1d7   : > { %v445_v20 = vpop.f32.mrb[2].mxu1  ;;  %v504_v21 = vpop.f32.mrb[4].mxu0 }
 0x1d8   : > { %v511_v22 = vmax.f32 %v442_v17, %v510_v18  ;;  %v516_v23 = vrot.slane %v504_v21, 4  ;;  %v871_v24 = vpop.f32.mrb[3].mxu1  ;;  %v876_v25 = vpop.f32.mrb[5].mxu0 }
 0x1d9   : > { %v507_v26 = vpop.f32.mrb[6].mxu0 }
 0x1da   : > { %v512_v27 = vrot.slane %v511_v22, 2  ;;  %v517_v28 = vmax.f32 %v504_v21, %v516_v23  ;;  %v877_v29 = vpop.f32.mrb[7].mxu0 }
 0x1dc   : > { %v513_v30 = vmax.f32 %v511_v22, %v512_v27  ;;  %v518_v31 = vrot.slane %v517_v28, 2 }
 0x1de   : > { %v514_v32 = vrot.slane %v513_v30, 1  ;;  %v519_v33 = vmax.f32 %v517_v28, %v518_v31 }
 0x1e0   : > { %v515_v34 = vmax.f32 %v513_v30, %v514_v32  ;;  %v520_v35 = vrot.slane %v519_v33, 1 }
 0x1e2   : > { %v522_v36 = vsub.f32 %v442_v17, %v515_v34  ;;  %v521_v37 = vmax.f32 %v519_v33, %v520_v35 }
 0x1e4   : > { %v524_v38 = vmul.f32 1.442695, %v522_v36  ;;  %v523_v39 = vsub.f32 %v504_v21, %v521_v37 }
 0x1e6   : > { %973 = vpow2.f32 %v524_v38  ;;  %v526_v40 = vmul.f32 1.442695, %v523_v39 }
 0x1e8   : > { %975 = vpow2.f32 %v526_v40 }
 0x1f0   : > { %v974_v41 = vpop.eup %973 }
 0x1f1   : > { %v540_v42 = vpack.c.bf16 %v974_v41, %v974_v41  ;;  %v528_v51 = vrot.slane %v974_v41, 4 }
 0x1f2   : > { %v976_v43 = vpop.eup %975 }
 0x1f3   : > { %v546_v44 = vsel %vm404_vm3, %v540_v42, 0  ;;  %v541_v45 = vpack.c.bf16 %v976_v43, %v976_v43  ;;  %v534_v52 = vrot.slane %v976_v43, 4  ;;  %v529_v53 = vadd.f32 %v974_v41, %v528_v51 }
 0x1f4   : > { %879 = vmatpush3.bf16.msra.mxu1 %v546_v44 }
 0x1f5   : > { %v592_v47 = vsel %vm404_vm3, %v541_v45, 0  ;;  %890 = vmatprep.subr.bf16.mxu1 %v1077_v0  ;;  %v535_v54 = vadd.f32 %v976_v43, %v534_v52  ;;  %v530_v55 = vrot.slane %v529_v53, 2 }
 0x1f6   : > { %885 = vmatpush3.bf16.msra.mxu0 %v592_v47 }
 0x1f7   : > { %881 = vmatmul.mubr.msk.bf16.vlgmr.msra.gmra.mrb[4].mxu1 %vm400_vm4, %v320_v46  ;;  %v536_v56 = vrot.slane %v535_v54, 2  ;;  %v531_v57 = vadd.f32 %v530_v55, %v529_v53 }
 0x1f8   : > { %892 = vmatprep.mubr.msk.bf16.mxu1 %vm1078_vm0, %v1077_v0 }
 0x1f9   : > { %887 = vmatmul.mubr.msk.bf16.vlgmr.msra.gmra.mrb[8].mxu0 %vm400_vm4, %v321_v48  ;;  %v537_v58 = vadd.f32 %v536_v56, %v535_v54  ;;  %v532_v59 = vrot.slane %v531_v57, 1 }
 0x1fb   : > { %v538_v60 = vrot.slane %v537_v58, 1  ;;  %v533_v61 = vadd.f32 %v532_v59, %v531_v57 }
 0x1fd   : > { %v539_v62 = vadd.f32 %v538_v60, %v537_v58  ;;  %977 = vrcp.f32 %v533_v61 }
 0x1ff   : > { %979 = vrcp.f32 %v539_v62 }
 0x207   : > { %v978_v63 = vpop.eup %977 }
 0x209   : > { %v980_v3 = vpop.eup %979 }
 0x2ca   : > { %v582_v0 = vpop.f32.mrb[4].mxu1 }
 0x2cb   : > { %v636_v1 = vmul.f32 %v978_v63, %v582_v0  ;;  %v882_v2 = vpop.f32.mrb[5].mxu1 }
 0x2cc   : > { %v585_v4 = vpop.f32.mrb[6].mxu1  ;;  %v628_v5 = vpop.f32.mrb[8].mxu0 }
 0x2cd   : > { %v637_v6 = vmul.f32 %v980_v3, %v628_v5  ;;  %v883_v7 = vpop.f32.mrb[7].mxu1  ;;  %v888_v8 = vpop.f32.mrb[9].mxu0 }
 0x2ce   : > { %v631_v9 = vpop.f32.mrb[10].mxu0 }
 0x2cf   : > { %v847_v10 = vpack.c.bf16 %v637_v6, %v636_v1  ;;  %v889_v11 = vpop.f32.mrb[11].mxu0 }
 0x2d1   : > { %891 = vmatpush3.bf16.msra.mxu1 %v847_v10 }
 0x2d4   : > { %893 = vmatmul.mubr.msk.bf16.vlgmr.msra.gmra.mrb[8].mxu1 %vm653_vm5, %v640_v12 }
 0x3a7   : > { %v691_v14 = vpop.f32.mrb[8].mxu1 }
 0x3a8   : > { %v894_v15 = vpop.f32.mrb[9].mxu1  ;;  %v692_v16 = vadd.f32 %v691_v14, %v645_v13 }
 0x3a9   : > { %v694_v17 = vpop.f32.mrb[10].mxu1 }
 0x3aa   : > { %697 = vst [vmem:[%s296_s13] sm:$0xf] %v692_v16  ;;  %v895_v18 = vpop.f32.mrb[11].mxu1 }
 0x3ab   : > { %994 = shalt.err (!%p991_p7)
}
 0x3ac   : > { %s995_s19 = scalar_lea.hbm %s1249_s8, 64  ;;  %s999_s30 = scalar_lea.hbm %s1308_s6, 256 }
 0x3ad   : > { %p996_p9 = scmp.ne.s32.totalorder %s1249_s8, %s995_s19  ;;  %p1000_p12 = scmp.lt.u32.totalorder %s1249_s8, %s1308_s6 }
 0x3ae   : > { %p1001_p13 = scmp.lt.u32.totalorder %s999_s30, %s995_s19  ;;  %p1003_p1 = scmp.lt.u32.totalorder %s995_s19, %s1249_s8 }
 0x3af   : > { %p997_p10 = pnand %p996_p9, %p1167_p3 }
 0x3b0   : > { %p1002_p0 = por %p1001_p13, %p1000_p12 }
 0x3b1   : > { %p998_p11 = pneg %p997_p10 }
 0x3b2   : > { %p1004_p2 = por %p1003_p1, %p1002_p0 }
 0x3b4   : > { %p1005_p4 = pnand %p1004_p2, %p998_p11 }
 0x3b6   : > { %1008 = shalt.err (!%p1005_p4)
}
 0x3b7   : > { %896 = dma.vmem_to_hbm [thread:$0]  (%p1167_p3), %s1251_s14, 64, %s1249_s8, %s699_s24  }
 0x3b8 PF: > { %p902_p5 = scmp.ge.s32.totalorder %s1075_s28, 2  ;;  %s726_s13 = sand.u32 1, %s1047_s21  }
 0x3b9   : > { %s727_s27 = scalar_lea.sflag [#allocation3], %s726_s13 }
 0x3ba   : > { %p899_p6 = pnand %p902_p5, %p1176_p8 }
 0x3bc   : > { %1042 = dma.done.wait (!%p899_p6), %s727_s27, 64  }
 0x3bd   : > { %1044 = vsyncadd (!%p899_p6), %s727_s27, 4294967232  ;;  %s19_s28 = sadd.s32 1, %s1075_s28   ;;  %s1317_s25 = sld [smem:[#allocation5_spill]] }
 0x3be   : > { %p16_p7 = scmp.ge.s32.totalorder %s19_s28, 6   ;;  %s1318_s10 = sld [smem:[#allocation6_spill]] }
 0x3bf   : > { %s1319_s27 = sld [smem:[#allocation7_spill]]  ;;  %s1320_s21 = smov %s1051_s22 }
 0x3c0   : > { %s1321_s22 = smov %s1055_s23  ;;  %s1322_s23 = smov %s1185_s15 }
 0x3c1   : > { %s1323_s24 = smov %s1067_s26  ;;  %18 = sbr.rel (!%p16_p7) target bundleno = 5 (0x5), region = 85 }
 0x3c4   : > { %s1324_s26 = smov %s1318_s10 }
 0x3c8   :  { %732 = vsyncpa [#allocation3], 1 }
 0x3c9   :  { %734 = vsyncpa [#allocation3 + $0x1], 1 }

</bundles_post_ra>
